<compile_context>
chip_gen: v6e
topology: v6e:2x2x1
jax: 0.10.0
libtpu: 0.0.40
codegen_flags: <defaults>
</compile_context>

<pallas_src>
import jax
import jax.numpy as jnp
from jax.experimental import pallas as pl
from jax.experimental.pallas import tpu as pltpu

# Pin matmul precision so the pure-JAX reference uses true-f32 dots; TPU's
# default demotes f32 matmuls to bf16, which could flip the top-2 routing
# choice near ties and make the correctness check flaky.
jax.config.update("jax_default_matmul_precision", "highest")

# ---------------- model dims (match MoEPatternModel) ----------------
VOCAB = 1000
HIDDEN = 64          # hidden_size
FFN = 32             # intermediate_size
NUM_EXPERTS = 3
TOP_K = 2

LANES = 128                        # one vreg-width half of the packed w13
GATE_OFF = NUM_EXPERTS * FFN       # 96: gate columns live in the G-half pad lanes
assert GATE_OFF + 8 <= LANES


# ---------------- Pallas kernel: fused router + MoE MLP for one token tile ----------------
def moe_fused_kernel(h_ref, w13_ref, w2s_ref, expand_ref, o_ref):
    # h_ref      : (tT, 64)   activations (also the residual)
    # w13_ref    : (64, 256)  [G0|G1|G2|gate|0 || U0|U1|U2|0]   (resident)
    # w2s_ref    : (128, 64)  stacked w2.T, zero-padded rows     (resident)
    # expand_ref : (8, 128)   routing band expansion (0/1)       (resident)
    # o_ref      : (tT, 64)   residual + MoE output
    h = h_ref[...]                                                       # f32

    # One lane-dense MXU pass: every expert's w1/w3 projection AND the router
    # logits (gate columns packed into the G-half pad lanes).
    gu = jnp.dot(h, w13_ref[...], preferred_element_type=jnp.float32)    # (tT, 256)

    # ---- fused router: softmax over 3 experts, top-2 == drop-the-min, renorm ----
    l8 = gu[:, GATE_OFF:GATE_OFF + 8]                # (tT, 8); lanes >= 3 are zero columns
    valid = jax.lax.broadcasted_iota(jnp.int32, l8.shape, 1) < NUM_EXPERTS
    m = jnp.max(l8, axis=-1, keepdims=True)          # rw is scale-invariant in m
    e = jnp.where(valid, jnp.exp(l8 - m), 0.0)       # unnormalized probs
    s = jnp.sum(e, axis=-1, keepdims=True)
    emin = jnp.min(jnp.where(valid, e, jnp.inf), axis=-1, keepdims=True)
    # NOTE: differs from torch.topk only when two probabilities are bit-identical
    # at the minimum (both dropped) — measure-zero in practice.
    rw8 = jnp.where(e == emin, 0.0, e) / (s - emin)  # (tT, 8); lanes >= 3 stay 0

    # ---- experts: full-vreg SiLU-gate (no per-expert 32-lane slicing) ----
    g_all = gu[:, :LANES]                            # [G0|G1|G2|gate/pad]
    u_all = gu[:, LANES:]                            # [U0|U1|U2|0]
    inter = (g_all * jax.nn.sigmoid(g_all)) * u_all  # pad lanes are exactly 0

    # ---- routing weights expanded to 128 lanes with one tiny MXU matmul ----
    rw_b = jnp.dot(rw8, expand_ref[...], preferred_element_type=jnp.float32)  # (tT, 128)

    # ---- down-projection + cross-expert accumulation + residual, one pass ----
    moe = jnp.dot(inter * rw_b, w2s_ref[...], preferred_element_type=jnp.float32)  # (tT, 64)
    o_ref[...] = h + moe


# ---------------- wrapper: tiling + pallas_call ----------------
def _round_up(n, m):
    return ((n + m - 1) // m) * m


def _choose_tile_T(T):
    # Big tiles amortize the ~0.35 us/step pipeline overhead; for T > 128 keep
    # >= 2 grid steps so the "parallel" axis shards across v7x's two TensorCores.
    if T <= 128:
        return _round_up(max(T, 8), 8)
    return min(1024, _round_up(pl.cdiv(T, 2), 8))


def moe_pallas(h, w13p, w2sp, expand):
    T, H = h.shape
    tile_T = _choose_tile_T(T)
    Tp = _round_up(T, tile_T)
    if Tp != T:
        h = jnp.pad(h, ((0, Tp - T), (0, 0)))    # zero rows -> zero output rows (dropped)

    out = pl.pallas_call(
        moe_fused_kernel,
        out_shape=jax.ShapeDtypeStruct((Tp, H), jnp.float32),
        grid_spec=pltpu.PrefetchScalarGridSpec(
            num_scalar_prefetch=0,
            grid=(Tp // tile_T,),
            in_specs=[
                pl.BlockSpec((tile_T, H), lambda i: (i, 0)),       # activations / residual
                pl.BlockSpec((H, 2 * LANES), lambda i: (0, 0)),    # packed [w1|gate|w3] (resident)
                pl.BlockSpec((LANES, H), lambda i: (0, 0)),        # packed w2 (resident)
                pl.BlockSpec((8, LANES), lambda i: (0, 0)),        # routing band expansion (resident)
            ],
            out_specs=pl.BlockSpec((tile_T, H), lambda i: (i, 0)),
        ),
        compiler_params=pltpu.CompilerParams(
            dimension_semantics=("parallel",),
            vmem_limit_bytes=32 * 1024 * 1024,
        ),
    )(h, w13p, w2sp, expand)
    return out[:T]


# ---------------- full model forward (embedding gather in XLA, MoE in Pallas) ----------------
def moe_pattern_model_forward(x_ids, packed):
    # TODO(synk): optionally fuse the 256 KB embedding gather into the kernel
    # (ids via scalar prefetch + DMA gather) once the row-gather lowering is verified.
    emb = jnp.take(packed["embedding"], x_ids, axis=0)        # (B, S, H) f32
    B, S, H = emb.shape
    out = moe_pallas(emb.reshape(-1, H), packed["w13p"], packed["w2sp"], packed["expand"])
    return out.reshape(B, S, H)


# ---------------- one-time weight packing (hoisted out of the jitted forward) ----------------
def pack_params(params):
    w1, w3, w2, gate = params["w1"], params["w3"], params["w2"], params["gate"]
    E, F, H = w1.shape                                        # (3, 32, 64)
    G = jnp.transpose(w1, (2, 0, 1)).reshape(H, E * F)        # col e*F+f = w1[e, f, :]
    U = jnp.transpose(w3, (2, 0, 1)).reshape(H, E * F)        # col e*F+f = w3[e, f, :]
    g_half = jnp.concatenate(
        [G, gate.T, jnp.zeros((H, LANES - E * F - E), jnp.float32)], axis=1)   # (64, 128)
    u_half = jnp.concatenate(
        [U, jnp.zeros((H, LANES - E * F), jnp.float32)], axis=1)               # (64, 128)
    w13p = jnp.concatenate([g_half, u_half], axis=1)                           # (64, 256)

    w2sp = jnp.concatenate(
        [jnp.transpose(w2, (0, 2, 1)).reshape(E * F, H),
         jnp.zeros((LANES - E * F, H), jnp.float32)], axis=0)                  # (128, 64)

    rows = jnp.arange(8)[:, None]
    band = (jnp.arange(LANES) // F)[None, :]
    expand = ((rows == band) & (rows < E)).astype(jnp.float32)                 # (8, 128)

    return {"embedding": params["embedding"], "w13p": w13p, "w2sp": w2sp, "expand": expand}


# ---------------- pure-JAX reference (mirrors the PyTorch module) ----------------
def reference_forward(x_ids, params):
    emb = jnp.take(params["embedding"], x_ids, axis=0)
    B, S, H = emb.shape
    h = emb.reshape(-1, H)
    logits = h @ params["gate"].T
    probs = jax.nn.softmax(logits.astype(jnp.float32), axis=-1)
    topv, topi = jax.lax.top_k(probs, TOP_K)
    topv = topv / jnp.sum(topv, axis=-1, keepdims=True)
    T = h.shape[0]
    rw = jnp.zeros((T, NUM_EXPERTS), jnp.float32).at[
        jnp.arange(T)[:, None], topi].add(topv)
    acc = jnp.zeros_like(h)
    for e in range(NUM_EXPERTS):
        g = h @ params["w1"][e].T
        u = h @ params["w3"][e].T
        inter = (g * jax.nn.sigmoid(g)) * u
        acc = acc + (inter @ params["w2"][e].T) * rw[:, e:e + 1]
    return (h + acc).reshape(B, S, H)


def make_params(key):
    ks = jax.random.split(key, 5)
    return {
        "embedding": jax.random.normal(ks[0], (VOCAB, HIDDEN), jnp.float32),
        "gate": jax.random.normal(ks[1], (NUM_EXPERTS, HIDDEN), jnp.float32) * 0.05,
        "w1": jax.random.normal(ks[2], (NUM_EXPERTS, FFN, HIDDEN), jnp.float32) * 0.05,
        "w3": jax.random.normal(ks[3], (NUM_EXPERTS, FFN, HIDDEN), jnp.float32) * 0.05,
        "w2": jax.random.normal(ks[4], (NUM_EXPERTS, HIDDEN, FFN), jnp.float32) * 0.05,
    }


if __name__ == "__main__":
    key = jax.random.PRNGKey(0)
    pkey, xkey = jax.random.split(key)
    params = make_params(pkey)
    packed = pack_params(params)   # packed once, outside the jitted forward

    # token ids, small shapes: batch=2, seq=8 -> T = 16 tokens
    x = jax.random.randint(xkey, (2, 8), 0, VOCAB, dtype=jnp.int32)

    fwd = jax.jit(moe_pattern_model_forward)
    out = jax.block_until_ready(fwd(x, packed))

    ref = reference_forward(x, params)
    assert out.shape == (2, 8, HIDDEN)
    max_err = float(jnp.max(jnp.abs(out - ref)))
    assert jnp.allclose(out, ref, atol=1e-4, rtol=1e-4), f"mismatch vs reference (max abs err {max_err})"

    print("KERNEL_OK")
</pallas_src>

<mosaic_0001>
module attributes {stable_mosaic.version = 11 : i64} {
  func.func @moe_fused_kernel(%arg0: i32, %arg1: memref<16x64xf32, #tpu.memory_space<vmem>>, %arg2: memref<64x256xf32, #tpu.memory_space<vmem>>, %arg3: memref<128x64xf32, #tpu.memory_space<vmem>>, %arg4: memref<8x128xf32, #tpu.memory_space<vmem>>, %arg5: memref<16x64xf32, #tpu.memory_space<vmem>>) attributes {dimension_semantics = [#tpu.dimension_semantics<parallel>], iteration_bounds = array<i64: 1>, scalar_prefetch = 0 : i64, scratch_operands = 0 : i64, tpu.core_type = #tpu.core_type<tc>, window_params = [{transform_indices = @transform_0, window_bounds = array<i64: 16, 64>}, {pipeline_mode = #tpu.pipeline_mode<synchronous>, transform_indices = @transform_1, window_bounds = array<i64: 64, 256>}, {pipeline_mode = #tpu.pipeline_mode<synchronous>, transform_indices = @transform_2, window_bounds = array<i64: 128, 64>}, {pipeline_mode = #tpu.pipeline_mode<synchronous>, transform_indices = @transform_3, window_bounds = array<i64: 8, 128>}, {transform_indices = @transform_4, window_bounds = array<i64: 16, 64>}]} {
    %c0 = arith.constant 0 : index
    %c0_0 = arith.constant 0 : index
    %0 = vector.load %arg1[%c0, %c0_0] : memref<16x64xf32, #tpu.memory_space<vmem>>, vector<16x64xf32>
    %c0_1 = arith.constant 0 : index
    %c0_2 = arith.constant 0 : index
    %1 = vector.load %arg2[%c0_1, %c0_2] : memref<64x256xf32, #tpu.memory_space<vmem>>, vector<64x256xf32>
    %cst = arith.constant dense<0.000000e+00> : vector<16x256xf32>
    %2 = tpu.matmul %0, %1, %cst {dimension_numbers = #tpu.dot_dimension_numbers<[1], [0], [0], [1], [0, 0, 1, 1], [], []>, precision = #tpu.contract_precision<fp32>} : vector<16x64xf32>, vector<64x256xf32>, vector<16x256xf32> -> vector<16x256xf32>
    %3 = vector.extract_strided_slice %2 {offsets = [0, 96], sizes = [16, 8], strides = [1, 1]} : vector<16x256xf32> to vector<16x8xf32>
    %4 = tpu.iota {dimensions = array<i32: 1>} : vector<16x8xi32>
    %c3_i32 = arith.constant 3 : i32
    %5 = vector.broadcast %c3_i32 : i32 to vector<16x8xi32>
    %6 = arith.cmpi slt, %4, %5 : vector<16x8xi32>
    %cst_3 = arith.constant dense<0xFF800000> : vector<16xf32>
    %7 = vector.multi_reduction <maximumf>, %3, %cst_3 [1] : vector<16x8xf32> to vector<16xf32>
    %8 = vector.shape_cast %7 : vector<16xf32> to vector<16x1xf32>
    %9 = vector.broadcast %8 : vector<16x1xf32> to vector<16x8xf32>
    %10 = arith.subf %3, %9 : vector<16x8xf32>
    %11 = math.exp %10 : vector<16x8xf32>
    %cst_4 = arith.constant 0.000000e+00 : f32
    %12 = vector.broadcast %cst_4 : f32 to vector<16x8xf32>
    %13 = arith.select %6, %11, %12 : vector<16x8xi1>, vector<16x8xf32>
    %cst_5 = arith.constant dense<0.000000e+00> : vector<16xf32>
    %14 = vector.multi_reduction <add>, %13, %cst_5 [1] : vector<16x8xf32> to vector<16xf32>
    %15 = vector.shape_cast %14 : vector<16xf32> to vector<16x1xf32>
    %cst_6 = arith.constant 0x7F800000 : f32
    %16 = vector.broadcast %cst_6 : f32 to vector<16x8xf32>
    %17 = arith.select %6, %13, %16 : vector<16x8xi1>, vector<16x8xf32>
    %cst_7 = arith.constant dense<0x7F800000> : vector<16xf32>
    %18 = vector.multi_reduction <minimumf>, %17, %cst_7 [1] : vector<16x8xf32> to vector<16xf32>
    %19 = vector.shape_cast %18 : vector<16xf32> to vector<16x1xf32>
    %20 = vector.broadcast %19 : vector<16x1xf32> to vector<16x8xf32>
    %21 = arith.cmpf oeq, %13, %20 : vector<16x8xf32>
    %cst_8 = arith.constant 0.000000e+00 : f32
    %22 = vector.broadcast %cst_8 : f32 to vector<16x8xf32>
    %23 = arith.select %21, %22, %13 : vector<16x8xi1>, vector<16x8xf32>
    %24 = arith.subf %15, %19 : vector<16x1xf32>
    %25 = vector.broadcast %24 : vector<16x1xf32> to vector<16x8xf32>
    %26 = arith.divf %23, %25 : vector<16x8xf32>
    %27 = vector.extract_strided_slice %2 {offsets = [0, 0], sizes = [16, 128], strides = [1, 1]} : vector<16x256xf32> to vector<16x128xf32>
    %28 = vector.extract_strided_slice %2 {offsets = [0, 128], sizes = [16, 128], strides = [1, 1]} : vector<16x256xf32> to vector<16x128xf32>
    %29 = arith.negf %27 : vector<16x128xf32>
    %30 = math.exp %29 : vector<16x128xf32>
    %cst_9 = arith.constant 1.000000e+00 : f32
    %31 = vector.broadcast %cst_9 : f32 to vector<16x128xf32>
    %32 = arith.addf %31, %30 : vector<16x128xf32>
    %33 = arith.divf %31, %32 : vector<16x128xf32>
    %34 = arith.mulf %27, %33 : vector<16x128xf32>
    %35 = arith.mulf %34, %28 : vector<16x128xf32>
    %c0_10 = arith.constant 0 : index
    %c0_11 = arith.constant 0 : index
    %36 = vector.load %arg4[%c0_10, %c0_11] : memref<8x128xf32, #tpu.memory_space<vmem>>, vector<8x128xf32>
    %cst_12 = arith.constant dense<0.000000e+00> : vector<16x128xf32>
    %37 = tpu.matmul %26, %36, %cst_12 {dimension_numbers = #tpu.dot_dimension_numbers<[1], [0], [0], [1], [0, 0, 1, 1], [], []>, precision = #tpu.contract_precision<fp32>} : vector<16x8xf32>, vector<8x128xf32>, vector<16x128xf32> -> vector<16x128xf32>
    %38 = arith.mulf %35, %37 : vector<16x128xf32>
    %c0_13 = arith.constant 0 : index
    %c0_14 = arith.constant 0 : index
    %39 = vector.load %arg3[%c0_13, %c0_14] : memref<128x64xf32, #tpu.memory_space<vmem>>, vector<128x64xf32>
    %cst_15 = arith.constant dense<0.000000e+00> : vector<16x64xf32>
    %40 = tpu.matmul %38, %39, %cst_15 {dimension_numbers = #tpu.dot_dimension_numbers<[1], [0], [0], [1], [0, 0, 1, 1], [], []>, precision = #tpu.contract_precision<fp32>} : vector<16x128xf32>, vector<128x64xf32>, vector<16x64xf32> -> vector<16x64xf32>
    %41 = arith.addf %0, %40 : vector<16x64xf32>
    %c0_16 = arith.constant 0 : index
    %c0_17 = arith.constant 0 : index
    %42 = vector.load %arg5[%c0_16, %c0_17] : memref<16x64xf32, #tpu.memory_space<vmem>>, vector<16x64xf32>
    tpu.vector_store %arg5[%c0_16, %c0_17], %41 {strides = array<i32>} : memref<16x64xf32, #tpu.memory_space<vmem>>, vector<16x64xf32>,
    return
  }
  func.func @transform_0(%arg0: i32) -> (i32, i32) {
    %c0_i32 = arith.constant 0 : i32
    %c0_i32_0 = arith.constant 0 : i32
    return %arg0, %c0_i32 : i32, i32
  }
  func.func @transform_1(%arg0: i32) -> (i32, i32) {
    %c0_i32 = arith.constant 0 : i32
    %c0_i32_0 = arith.constant 0 : i32
    %c0_i32_1 = arith.constant 0 : i32
    return %c0_i32, %c0_i32_0 : i32, i32
  }
  func.func @transform_2(%arg0: i32) -> (i32, i32) {
    %c0_i32 = arith.constant 0 : i32
    %c0_i32_0 = arith.constant 0 : i32
    %c0_i32_1 = arith.constant 0 : i32
    return %c0_i32, %c0_i32_0 : i32, i32
  }
  func.func @transform_3(%arg0: i32) -> (i32, i32) {
    %c0_i32 = arith.constant 0 : i32
    %c0_i32_0 = arith.constant 0 : i32
    %c0_i32_1 = arith.constant 0 : i32
    return %c0_i32, %c0_i32_0 : i32, i32
  }
  func.func @transform_4(%arg0: i32) -> (i32, i32) {
    %c0_i32 = arith.constant 0 : i32
    %c0_i32_0 = arith.constant 0 : i32
    return %arg0, %c0_i32 : i32, i32
  }
}

</mosaic_0001>

<bundles_post_ra>
// kernel: moe_pattern_model_forward.1
= control target key start
LH: loop header
LB: loop body
LE: loop exit
PB: predicated region body
PF: predicated region fallthrough
CT: control target
= control target key end

     0   :  { %v2437_v9 = vmov 0.0   ;;  %vm36_vm0 = vcmask 523264   ;;  %s3267_s0 = inlined_call_operand.vmem [shape: f32[16,64], index: 0, kind: input, shape index: {}]   ;;  %s3268_s1 = inlined_call_operand.vmem [shape: f32[64,256], index: 1, kind: input, shape index: {}]   ;;  %s3269_s2 = inlined_call_operand.vmem [shape: f32[128,64], index: 2, kind: input, shape index: {}]   ;;  %s3270_s3 = inlined_call_operand.vmem [shape: f32[8,128], index: 3, kind: input, shape index: {}]   ;;  %s3271_s4 = inlined_call_operand.hbm [shape: f32[16,64], index: 4, kind: output, shape index: {}]  }
   0x1   :  { %v35_v0 = vld [vmem:[%s3268_s1 + $0x78] sm:$0xff]  ;;  %v34_v1 = vld [vmem:[%s3268_s1 + $0x70] sm:$0xff]  ;;  %v33_v2 = vld [vmem:[%s3268_s1 + $0x68] sm:$0xff]  ;;  %123 = vmatprep.mubr.f32.mxu0 %v2437_v9  ;;  %290 = vmatprep.mubr.f32.mxu1 %v2437_v9 }
   0x2   :  { %v2476_v3 = vand.u32 4294901760, %v35_v0  ;;  %v2478_v4 = vand.u32 4294901760, %v34_v1  ;;  %v2480_v5 = vand.u32 4294901760, %v33_v2  ;;  %v32_v6 = vld [vmem:[%s3268_s1 + $0x60] sm:$0xff]  ;;  %v31_v7 = vld [vmem:[%s3268_s1 + $0x58] sm:$0xff]  ;;  %v30_v8 = vld [vmem:[%s3268_s1 + $0x50] sm:$0xff] }
   0x3   :  { %v2493_v10 = vand.u32 4294901760, %v32_v6  ;;  %v2495_v11 = vand.u32 4294901760, %v31_v7  ;;  %v2497_v12 = vand.u32 4294901760, %v30_v8  ;;  %v29_v13 = vld [vmem:[%s3268_s1 + $0x48] sm:$0xff]  ;;  %v28_v14 = vld [vmem:[%s3268_s1 + $0x40] sm:$0xff]  ;;  %v27_v15 = vld [vmem:[%s3268_s1 + $0x38] sm:$0xff] }
   0x4   :  { %60 = vmatprep.subr.mxu0 %v2476_v3  ;;  %v2509_v16 = vand.u32 4294901760, %v29_v13  ;;  %v2511_v17 = vand.u32 4294901760, %v28_v14  ;;  %v2513_v18 = vand.u32 4294901760, %v27_v15  ;;  %v2516_v19 = vsub.f32 %v35_v0, %v2476_v3  ;;  %v26_v20 = vld [vmem:[%s3268_s1 + $0x30] sm:$0xff]  ;;  %v2524_v21 = vld [vmem:[%s3268_s1 + $0x28] sm:$0xff]  ;;  %v2529_v22 = vld [vmem:[%s3268_s1 + $0x20] sm:$0xff] }
   0x5   :  { %62 = vmatpush1.msra.mxu0 %v2478_v4  ;;  %v2532_v23 = vand.u32 4294901760, %v26_v20  ;;  %v2535_v24 = vsub.f32 %v34_v1, %v2478_v4  ;;  %v2538_v25 = vand.u32 4294901760, %v2524_v21  ;;  %v2541_v26 = vsub.f32 %v33_v2, %v2480_v5  ;;  %v2546_v27 = vld [vmem:[%s3268_s1 + $0x18] sm:$0xff]  ;;  %v2551_v28 = vld [vmem:[%s3268_s1 + $0x10] sm:$0xff]  ;;  %v2556_v29 = vld [vmem:[%s3268_s1 + $0x8] sm:$0xff] }
   0x6   :  { %64 = vmatprep.subr.mxu0 %v2480_v5  ;;  %v164_v30 = vand.u32 4294901760, %v2516_v19  ;;  %v2561_v31 = vand.u32 4294901760, %v2529_v22  ;;  %v2564_v32 = vsub.f32 %v32_v6, %v2493_v10  ;;  %v2567_v33 = vand.u32 4294901760, %v2546_v27  ;;  %v2581_v38 = vld [vmem:[%s3268_s1] sm:$0xff] }
   0x7   :  { %66 = vmatpush1.msra.mxu0 %v2493_v10  ;;  %v170_v34 = vand.u32 4294901760, %v2535_v24  ;;  %v176_v35 = vand.u32 4294901760, %v2541_v26  ;;  %v2573_v36 = vsub.f32 %v31_v7, %v2495_v11  ;;  %v2576_v37 = vand.u32 4294901760, %v2551_v28 }
   0x8   :  { %9 = vsyncpa [#allocation3], 0  ;;  %68 = vmatprep.subr.mxu0 %v2495_v11  ;;  %v165_v39 = vsub.f32 %v2516_v19, %v164_v30  ;;  %v182_v40 = vand.u32 4294901760, %v2564_v32  ;;  %v2589_v41 = vsub.f32 %v30_v8, %v2497_v12  ;;  %v2592_v42 = vand.u32 4294901760, %v2556_v29  ;;  %v18_v51 = vld [vmem:[%s3267_s0] sm:$0xff]  ;;  %v19_v0 = vld [vmem:[%s3267_s0 + $0x8] sm:$0xff] }
   0x9   :  { %70 = vmatpush1.msra.mxu0 %v2497_v12  ;;  %v171_v43 = vsub.f32 %v2535_v24, %v170_v34  ;;  %v177_v44 = vsub.f32 %v2541_v26, %v176_v35  ;;  %v188_v45 = vand.u32 4294901760, %v2573_v36  ;;  %v2603_v46 = vsub.f32 %v29_v13, %v2509_v16  ;;  %s2438_s24 = smov 32  }
   0xa   :  { %72 = vmatprep.subr.mxu0 %v2509_v16  ;;  %v166_v47 = vand.u32 4294901760, %v165_v39  ;;  %v183_v48 = vsub.f32 %v2564_v32, %v182_v40  ;;  %v194_v49 = vand.u32 4294901760, %v2589_v41  ;;  %v2611_v50 = vand.u32 4294901760, %v2581_v38 }
   0xb   :  { %74 = vmatpush1.msra.mxu0 %v2511_v17  ;;  %v172_v52 = vand.u32 4294901760, %v171_v43  ;;  %v178_v53 = vand.u32 4294901760, %v177_v44  ;;  %v189_v54 = vsub.f32 %v2573_v36, %v188_v45  ;;  %v200_v55 = vand.u32 4294901760, %v2603_v46 }
   0xc   :  { %76 = vmatprep.subr.mxu0 %v2513_v18  ;;  %167 = vmatprep.subr.mxu1 %v166_v47  ;;  %v184_v56 = vand.u32 4294901760, %v183_v48  ;;  %v195_v57 = vsub.f32 %v2589_v41, %v194_v49  ;;  %v2626_v58 = vsub.f32 %v28_v14, %v2511_v17  ;;  %v2629_v59 = vsub.f32 %v27_v15, %v2513_v18 }
   0xd   :  { %78 = vmatpush1.msra.mxu0 %v2532_v23  ;;  %173 = vmatpush1.msra.mxu1 %v172_v52  ;;  %v190_v60 = vand.u32 4294901760, %v189_v54  ;;  %v201_v61 = vsub.f32 %v2603_v46, %v200_v55  ;;  %v38_v62 = vsel %vm36_vm0, %v18_v51, 0  ;;  %v2637_v63 = vsub.f32 %v26_v20, %v2532_v23 }
   0xe   :  { %80 = vmatprep.subr.mxu0 %v2538_v25  ;;  %179 = vmatprep.subr.mxu1 %v178_v53  ;;  %v196_v1 = vand.u32 4294901760, %v195_v57  ;;  %v206_v2 = vand.u32 4294901760, %v2626_v58  ;;  %v212_v6 = vand.u32 4294901760, %v2629_v59  ;;  %v2645_v7 = vand.u32 4294901760, %v38_v62 }
   0xf   :  { %82 = vmatpush1.msra.mxu0 %v2561_v31  ;;  %185 = vmatpush1.msra.mxu1 %v184_v56  ;;  %v202_v8 = vand.u32 4294901760, %v201_v61  ;;  %v218_v13 = vand.u32 4294901760, %v2637_v63  ;;  %v2651_v14 = vsub.f32 %v2524_v21, %v2538_v25  ;;  %v2655_v15 = vsub.f32 %v2529_v22, %v2561_v31 }
  0x10   :  { %84 = vmatprep.subr.mxu0 %v2567_v33  ;;  %191 = vmatprep.subr.mxu1 %v190_v60  ;;  %v207_v20 = vsub.f32 %v2626_v58, %v206_v2  ;;  %v213_v39 = vsub.f32 %v2629_v59, %v212_v6  ;;  %v2665_v43 = vsub.f32 %v38_v62, %v2645_v7  ;;  %v41_v21 = vsel %vm36_vm0, %v19_v0, 0 }
  0x11   :  { %86 = vmatpush1.msra.mxu0 %v2576_v37  ;;  %197 = vmatpush1.msra.mxu1 %v196_v1  ;;  %v219_v22 = vsub.f32 %v2637_v63, %v218_v13  ;;  %v224_v44 = vand.u32 4294901760, %v2651_v14  ;;  %v230_v47 = vand.u32 4294901760, %v2655_v15  ;;  %v2676_v48 = vsub.f32 %v2546_v27, %v2567_v33 }
  0x12   :  { %88 = vmatprep.subr.mxu0 %v2592_v42  ;;  %203 = vmatprep.subr.mxu1 %v202_v8  ;;  %v208_v51 = vand.u32 4294901760, %v207_v20  ;;  %v214_v52 = vand.u32 4294901760, %v213_v39  ;;  %v126_v53 = vand.u32 4294901760, %v2665_v43  ;;  %v2682_v54 = vsub.f32 %v2551_v28, %v2576_v37 }
  0x13   :  { %90 = vmatpush1.msra.mxu0 %v2611_v50  ;;  %v220_v56 = vand.u32 4294901760, %v219_v22  ;;  %v225_v57 = vsub.f32 %v2651_v14, %v224_v44  ;;  %v231_v27 = vsub.f32 %v2655_v15, %v230_v47  ;;  %v236_v60 = vand.u32 4294901760, %v2676_v48 }
  0x14   :  { %209 = vmatpush1.msra.mxu1 %v208_v51  ;;  %323 = vmatprep.subr.mxu0 %v2516_v19  ;;  %v127_v28 = vsub.f32 %v2665_v43, %v126_v53  ;;  %v242_v61 = vand.u32 4294901760, %v2682_v54  ;;  %v2699_v62 = vsub.f32 %v2556_v29, %v2592_v42  ;;  %v2703_v0 = vsub.f32 %v2581_v38, %v2611_v50 }
  0x15   :  { %215 = vmatprep.subr.mxu1 %v214_v52  ;;  %v226_v1 = vand.u32 4294901760, %v225_v57  ;;  %v232_v8 = vand.u32 4294901760, %v231_v27  ;;  %v237_v20 = vsub.f32 %v2676_v48, %v236_v60  ;;  %v2708_v39 = vand.u32 4294901760, %v41_v21 }
  0x16   :  { %v128_v22 = vand.u32 4294901760, %v127_v28  ;;  %221 = vmatpush1.msra.mxu1 %v220_v56  ;;  %v243_v29 = vsub.f32 %v2682_v54, %v242_v61  ;;  %v248_v51 = vand.u32 4294901760, %v2699_v62  ;;  %v254_v38 = vand.u32 4294901760, %v2703_v0 }
  0x17   :  { %227 = vmatprep.subr.mxu1 %v226_v1  ;;  %v238_v52 = vand.u32 4294901760, %v237_v20  ;;  %v2716_v57 = vsub.f32 %v41_v21, %v2708_v39  ;;  %vm742_vm1 = vcmask 851712   ;;  %vm765_vm3 = vcmask 64512  }
  0x18   :  { %129 = vmatmul.mubr.f32.vlgmr.msra.gmra.mxu0 %v128_v22  ;;  %233 = vmatpush1.msra.mxu1 %v232_v8  ;;  %v244_v27 = vand.u32 4294901760, %v243_v29  ;;  %v249_v56 = vsub.f32 %v2699_v62, %v248_v51  ;;  %v255_v28 = vsub.f32 %v2703_v0, %v254_v38 }
  0x19   :  { %326 = vmatpush1.msra.mxu0 %v2535_v24  ;;  %239 = vmatprep.subr.mxu1 %v238_v52  ;;  %v137_v1 = vand.u32 4294901760, %v2716_v57 }
  0x1a   :  { %329 = vmatprep.subr.mxu0 %v2541_v26  ;;  %245 = vmatpush1.msra.mxu1 %v244_v27  ;;  %v250_v21 = vand.u32 4294901760, %v249_v56  ;;  %v256_v20 = vand.u32 4294901760, %v255_v28 }
  0x1b   :  { %332 = vmatpush1.msra.mxu0 %v2564_v32  ;;  %134 = vmatprep.mubr.f32.mxu0 %v2437_v9  ;;  %v138_v8 = vsub.f32 %v2716_v57, %v137_v1 }
  0x1c   :  { %335 = vmatprep.subr.mxu0 %v2573_v36  ;;  %251 = vmatprep.subr.mxu1 %v250_v21 }
  0x1d   :  { %338 = vmatpush1.msra.mxu0 %v2589_v41  ;;  %257 = vmatpush1.msra.mxu1 %v256_v20  ;;  %v139_v22 = vand.u32 4294901760, %v138_v8  ;;  %v806_v8 = vld [vmem:[%s3270_s3] sm:$0xff] }
  0x1e   :  { %341 = vmatprep.subr.mxu0 %v2603_v46  ;;  %292 = vmatmul.mubr.f32.vlgmr.msra.gmra.mxu1 %v2645_v7 }
  0x1f   :  { %344 = vmatpush1.msra.mxu0 %v2626_v58  ;;  %435 = vmatprep.subr.mxu1 %v2476_v3 }
  0x20   :  { %347 = vmatprep.subr.mxu0 %v2629_v59  ;;  %437 = vmatpush1.msra.mxu1 %v2478_v4 }
  0x21   :  { %350 = vmatpush1.msra.mxu0 %v2637_v63  ;;  %439 = vmatprep.subr.mxu1 %v2480_v5 }
  0x22   :  { %353 = vmatprep.subr.mxu0 %v2651_v14  ;;  %441 = vmatpush1.msra.mxu1 %v2493_v10 }
  0x23   :  { %356 = vmatpush1.msra.mxu0 %v2655_v15  ;;  %443 = vmatprep.subr.mxu1 %v2495_v11 }
  0x24   :  { %140 = vmatmul.mubr.f32.gmra.mxu0 %v139_v22  ;;  %359 = vmatprep.subr.mxu0 %v2676_v48  ;;  %v844_v22 = vand.u32 4294901760, %v806_v8 }
  0x25   :  { %362 = vmatpush1.msra.mxu0 %v2682_v54  ;;  %445 = vmatpush1.msra.mxu1 %v2497_v12 }
  0x26   :  { %365 = vmatprep.subr.mxu0 %v2699_v62  ;;  %447 = vmatprep.subr.mxu1 %v2509_v16 }
  0x27   :  { %368 = vmatpush1.msra.mxu0 %v2703_v0  ;;  %401 = vmatprep.mubr.f32.mxu0 %v2437_v9 }
  0x28   :  { %449 = vmatpush1.msra.mxu1 %v2511_v17  ;;  %297 = vmatprep.mubr.f32.mxu1 %v2437_v9 }
  0x29   :  { %404 = vmatmul.mubr.f32.vlgmr.msra.gmra.mxu0 %v2665_v43  ;;  %451 = vmatprep.subr.mxu1 %v2513_v18 }
  0x2a   :  { %536 = vmatprep.subr.mxu0 %v164_v30  ;;  %299 = vmatmul.mubr.f32.gmra.mxu1 %v2708_v39 }
  0x2b   :  { %453 = vmatpush1.msra.mxu1 %v2532_v23  ;;  %540 = vmatpush1.msra.mxu0 %v170_v34 }
  0x2c   :  { %455 = vmatprep.subr.mxu1 %v2538_v25  ;;  %544 = vmatprep.subr.mxu0 %v176_v35 }
  0x2d   :  { %409 = vmatprep.mubr.f32.mxu0 %v2437_v9  ;;  %457 = vmatpush1.msra.mxu1 %v2561_v31 }
  0x2e   :  { %548 = vmatpush1.msra.mxu0 %v182_v40  ;;  %459 = vmatprep.subr.mxu1 %v2567_v33 }
  0x2f   :  { %412 = vmatmul.mubr.f32.gmra.mxu0 %v2716_v57  ;;  %552 = vmatprep.subr.mxu0 %v188_v45 }
  0x30   :  { %461 = vmatpush1.msra.mxu1 %v2576_v37  ;;  %556 = vmatpush1.msra.mxu0 %v194_v49 }
  0x31   :  { %463 = vmatprep.subr.mxu1 %v2592_v42  ;;  %560 = vmatprep.subr.mxu0 %v200_v55 }
  0x32   :  { %465 = vmatpush1.msra.mxu1 %v2611_v50  ;;  %498 = vmatprep.mubr.f32.mxu1 %v2437_v9 }
  0x33   :  { %564 = vmatpush1.msra.mxu0 %v206_v2  ;;  %502 = vmatmul.mubr.f32.vlgmr.msra.gmra.mxu1 %v126_v53 }
  0x34   :  { %568 = vmatprep.subr.mxu0 %v212_v6  ;;  %661 = vmatprep.subr.mxu1 %v2476_v3 }
  0x35   :  { %572 = vmatpush1.msra.mxu0 %v218_v13  ;;  %663 = vmatpush1.msra.mxu1 %v2478_v4 }
  0x36   :  { %576 = vmatprep.subr.mxu0 %v224_v44  ;;  %665 = vmatprep.subr.mxu1 %v2480_v5 }
  0x37   :  { %507 = vmatprep.mubr.f32.mxu1 %v2437_v9  ;;  %580 = vmatpush1.msra.mxu0 %v230_v47 }
  0x38   :  { %667 = vmatpush1.msra.mxu1 %v2493_v10  ;;  %584 = vmatprep.subr.mxu0 %v236_v60 }
  0x39   :  { %511 = vmatmul.mubr.f32.gmra.mxu1 %v137_v1  ;;  %669 = vmatprep.subr.mxu1 %v2495_v11 }
  0x3a   :  { %588 = vmatpush1.msra.mxu0 %v242_v61  ;;  %671 = vmatpush1.msra.mxu1 %v2497_v12 }
  0x3b   :  { %592 = vmatprep.subr.mxu0 %v248_v51  ;;  %673 = vmatprep.subr.mxu1 %v2509_v16 }
  0x3c   :  { %596 = vmatpush1.msra.mxu0 %v254_v38  ;;  %629 = vmatprep.mubr.f32.mxu0 %v2437_v9 }
  0x3d   :  { %675 = vmatpush1.msra.mxu1 %v2511_v17  ;;  %631 = vmatmul.mubr.f32.vlgmr.msra.gmra.mxu0 %v2645_v7 }
  0x3e   :  { %677 = vmatprep.subr.mxu1 %v2513_v18  ;;  %636 = vmatprep.mubr.f32.mxu0 %v2437_v9 }
  0x3f   :  { %679 = vmatpush1.msra.mxu1 %v2532_v23  ;;  %724 = vmatprep.mubr.f32.mxu1 %v2437_v9 }
  0x40   :  { %681 = vmatprep.subr.mxu1 %v2538_v25  ;;  %2152 = vmatprep.subr.mxu0 %v844_v22 }
  0x41   :  { %683 = vmatpush1.msra.mxu1 %v2561_v31  ;;  %638 = vmatmul.mubr.f32.gmra.mxu0 %v2708_v39 }
  0x42   :  { %685 = vmatprep.subr.mxu1 %v2567_v33  ;;  %2153 = vmatpush3.msra.mxu0 %v844_v22 }
  0x43   :  { %687 = vmatpush1.msra.mxu1 %v2576_v37 }
  0x44   :  { %689 = vmatprep.subr.mxu1 %v2592_v42 }
  0x45   :  { %691 = vmatpush1.msra.mxu1 %v2611_v50 }
  0x46   :  { %726 = vmatmul.mubr.f32.vlgmr.msra.gmra.mxu1 %v2645_v7 }
  0x47   :  { %731 = vmatprep.mubr.f32.mxu1 %v2437_v9 }
  0x4a   :  { %733 = vmatmul.mubr.f32.gmra.mxu1 %v2708_v39  ;;  %v739_v39 = vlaneseq }
  0x4c   :  { %v740_v29 = vand.u32 127, %v739_v39  ;;  %v1316_v39 = vld [vmem:[%s3269_s2 + $0x60] sm:$0xff] }
  0x4e   :  { %vm741_vm2 = vcmp.lt.s32.totalorder %v740_v29, 3  ;;  %v2909_v29 = vand.u32 4294901760, %v1316_v39 }
  0xd8   :  { %v130_v3 = vpop.f32.mrf.mxu0 }
  0xda   :  { %v132_v5 = vpop.f32.mrf.mxu0 }
  0xde   :  { %v293_v4 = vpop.f32.mrf.mxu1 }
  0xdf   :  { %v294_v40 = vadd.f32 %v293_v4, %v130_v3  ;;  %v2848_v3 = vsub.f32 %v806_v8, %v844_v22 }
  0xe0   :  { %v295_v10 = vpop.f32.mrf.mxu1 }
  0xe1   :  { %v296_v11 = vadd.f32 %v295_v10, %v132_v5  ;;  %v2851_v4 = vand.u32 4294901760, %v2848_v3  ;;  %2162 = vmatprep.subr.mxu0 %v2848_v3 }
  0xe3   :  { %v933_v5 = vsub.f32 %v2848_v3, %v2851_v4 }
  0xe4   :  { %v141_v12 = vpop.f32.mrf.mxu0 }
  0xe5   :  { %v934_v10 = vand.u32 4294901760, %v933_v5 }
  0xe6   :  { %v143_v16 = vpop.f32.mrf.mxu0 }
  0xe7   :  { %2157 = vmatprep.subr.mxu1 %v934_v10 }
  0xe8   :  { %2158 = vmatpush3.msra.mxu1 %v934_v10 }
  0xe9   :  { %v405_v17 = vpop.f32.mrf.mxu0  ;;  %2167 = vmatprep.subr.mxu1 %v844_v22 }
  0xea   :  { %v300_v18 = vpop.f32.mrf.mxu1  ;;  %v406_v45 = vadd.f32 %v405_v17, %v294_v40 }
  0xeb   :  { %v407_v19 = vpop.f32.mrf.mxu0  ;;  %v301_v46 = vadd.f32 %v300_v18, %v141_v12 }
  0xec   :  { %v408_v23 = vadd.f32 %v407_v19, %v296_v11  ;;  %v302_v24 = vpop.f32.mrf.mxu1 }
  0xed   :  { %v303_v25 = vadd.f32 %v302_v24, %v143_v16 }
  0xef   :  { %v413_v26 = vpop.f32.mrf.mxu0 }
  0xf0   :  { %v414_v50 = vadd.f32 %v413_v26, %v301_v46 }
  0xf1   :  { %v415_v30 = vpop.f32.mrf.mxu0 }
  0xf2   :  { %v416_v31 = vadd.f32 %v415_v30, %v303_v25 }
  0xf3   :  { %v503_v32 = vpop.f32.mrf.mxu1 }
  0xf4   :  { %v504_v49 = vadd.f32 %v503_v32, %v406_v45 }
  0xf5   :  { %v505_v9 = vpop.f32.mrf.mxu1 }
  0xf6   :  { %v506_v33 = vadd.f32 %v505_v9, %v408_v23  ;;  %v1319_v23 = vld [vmem:[%s3269_s2 + $0x78] sm:$0xff] }
  0xf7   :  { %v2859_v26 = vand.u32 4294901760, %v1319_v23 }
  0xf9   :  { %v512_v34 = vpop.f32.mrf.mxu1 }
  0xfa   :  { %v513_v63 = vadd.f32 %v512_v34, %v414_v50 }
  0xfb   :  { %v514_v35 = vpop.f32.mrf.mxu1 }
  0xfc   :  { %v2829_v36 = vadd.f32 %v514_v35, %v416_v31  ;;  %v1318_v31 = vld [vmem:[%s3269_s2 + $0x70] sm:$0xff]  ;;  %v1317_v35 = vld [vmem:[%s3269_s2 + $0x68] sm:$0xff] }
  0xfd   :  { %v632_v37 = vpop.f32.mrf.mxu0  ;;  %v2868_v34 = vand.u32 4294901760, %v1318_v31  ;;  %v2876_v46 = vand.u32 4294901760, %v1317_v35 }
  0xfe   :  { %v633_v55 = vadd.f32 %v632_v37, %v504_v49 }
  0xff   :  { %v634_v41 = vpop.f32.mrf.mxu0  ;;  %v2879_v50 = vsub.f32 %v1318_v31, %v2868_v34 }
 0x100   :  { %v635_v42 = vadd.f32 %v634_v41, %v506_v33  ;;  %v2866_v33 = vsub.f32 %v1319_v23, %v2859_v26 }
 0x101   :  { %v639_v58 = vpop.f32.mrf.mxu0 }
 0x102   :  { %v640_v7 = vadd.f32 %v639_v58, %v513_v63  ;;  %v2874_v45 = vand.u32 4294901760, %v2866_v33 }
 0x106   :  { %v727_v59 = vpop.f32.mrf.mxu1 }
 0x107   :  { %v2831_v2 = vadd.f32 %v727_v59, %v633_v55 }
 0x108   :  { %v729_v6 = vpop.f32.mrf.mxu1 }
 0x109   :  { %v2833_v13 = vadd.f32 %v729_v6, %v635_v42  ;;  %v743_v14 = vsel %vm742_vm1, %v2831_v2, -inf  ;;  %v1425_v6 = vsub.f32 %v2866_v33, %v2874_v45 }
 0x10a   :  { %v734_v15 = vpop.f32.mrf.mxu1  ;;  %744 = vmax.xlane.f32.xlu0 %v743_v14  ;;  %v2888_v14 = vand.u32 4294901760, %v2879_v50 }
 0x10b   :  { %v2836_v43 = vadd.f32 %v734_v15, %v640_v7  ;;  %v2885_v7 = vsub.f32 %v1317_v35, %v2876_v46 }
 0x10d   :  { %v746_v44 = vsel %vm742_vm1, %v2836_v43, -inf }
 0x10e   :  { %747 = vmax.xlane.f32.xlu0 %v746_v44 }
 0x193   :  { %v745_v47 = vpop.xlane.xlu0 %744 }
 0x194   :  { %v749_v48 = vsub.f32 %v2831_v2, %v745_v47  ;;  %v1426_v47 = vand.u32 4294901760, %v1425_v6 }
 0x196   :  { %v751_v53 = vmul.f32 1.442695, %v749_v48  ;;  %v2891_v48 = vand.u32 4294901760, %v2885_v7 }
 0x197   :  { %v748_v54 = vpop.xlane.xlu0 %747 }
 0x198   :  { %2397 = vpow2.f32 %v751_v53  ;;  %v750_v60 = vsub.f32 %v2836_v43, %v748_v54  ;;  %3300 = vst [vmem:[#allocation5_spill] sm:$0xff] %v2891_v48  ;;  %v1432_v53 = vsub.f32 %v2879_v50, %v2888_v14 }
 0x19a   :  { %v753_v61 = vmul.f32 1.442695, %v750_v60 }
 0x19c   :  { %2399 = vpow2.f32 %v753_v61  ;;  %v1439_v61 = vsub.f32 %v2885_v7, %v2891_v48 }
 0x1a5   :  { %v2398_v62 = vpop.eup %2397 }
 0x1a6   :  { %757 = vrot.lane.b32.xlu1 %v2398_v62, %s2438_s24  ;;  %v1433_v62 = vand.u32 4294901760, %v1432_v53 }
 0x1a9   :  { %v2400_v0 = vpop.eup %2399 }
 0x1aa   :  { %759 = vrot.lane.b32.xlu1 %v2400_v0, %s2438_s24  ;;  %v1440_v0 = vand.u32 4294901760, %v1439_v61 }
 0x218   :  { %v758_v51 = vpop.permute.xlu1 %757 }
 0x219   :  { %v763_v38 = vsel %vm741_vm2, %v758_v51, 0.0  ;;  %v772_v52 = vsel %vm741_vm2, %v758_v51, inf  ;;  %v1315_v51 = vld [vmem:[%s3269_s2 + $0x58] sm:$0xff] }
 0x21a   :  { %v766_v57 = vsel %vm765_vm3, %v763_v38, 0.0  ;;  %v774_v27 = vsel %vm765_vm3, %v772_v52, inf  ;;  %v2917_v52 = vand.u32 4294901760, %v1315_v51 }
 0x21b   :  { %767 = vadd.xlane.f32.xlu0 %v766_v57  ;;  %775 = vmin.xlane.f32.xlu1 %v774_v27  ;;  %v1314_v57 = vld [vmem:[%s3269_s2 + $0x50] sm:$0xff] }
 0x21c   :  { %v760_v56 = vpop.permute.xlu1 %759 }
 0x21d   :  { %v764_v28 = vsel %vm741_vm2, %v760_v56, 0.0  ;;  %v773_v21 = vsel %vm741_vm2, %v760_v56, inf  ;;  %v2928_v56 = vsub.f32 %v1315_v51, %v2917_v52 }
 0x21e   :  { %v769_v1 = vsel %vm765_vm3, %v764_v28, 0.0  ;;  %v777_v20 = vsel %vm765_vm3, %v773_v21, inf }
 0x21f   :  { %770 = vadd.xlane.f32.xlu0 %v769_v1  ;;  %v1313_v1 = vld [vmem:[%s3269_s2 + $0x48] sm:$0xff] }
 0x223   :  { %778 = vmin.xlane.f32.xlu0 %v777_v20  ;;  %v2940_v20 = vand.u32 4294901760, %v2928_v56 }
 0x225   :  { %3302 = vst [vmem:[#allocation7_spill] sm:$0xff] %v2940_v20  ;;  %v1453_v5 = vsub.f32 %v2928_v56, %v2940_v20 }
 0x2a4   :  { %v776_v11 = vpop.xlane.xlu1 %775  ;;  %v768_v12 = vpop.xlane.xlu0 %767 }
 0x2a5   :  { %v784_v16 = vsub.f32 %v768_v12, %v776_v11  ;;  %vm780_vm4 = vcmp.eq.f32.partialorder %v763_v38, %v776_v11 }
 0x2a6   :  { %v782_v25 = vsel %vm780_vm4, 0.0, %v763_v38  ;;  %v2915_v38 = vsub.f32 %v1316_v39, %v2909_v29 }
 0x2a7   :  { %2401 = vrcp.f32 %v784_v16  ;;  %v1311_v16 = vld [vmem:[%s3269_s2 + $0x38] sm:$0xff] }
 0x2a8   :  { %v771_v17 = vpop.xlane.xlu0 %770  ;;  %v2925_v27 = vand.u32 4294901760, %v2915_v38  ;;  %v2972_v23 = vand.u32 4294901760, %v1311_v16 }
 0x2aa   :  { %3301 = vst [vmem:[#allocation6_spill] sm:$0xff] %v2925_v27  ;;  %v1446_v21 = vsub.f32 %v2915_v38, %v2925_v27 }
 0x2ac   :  { %v779_v18 = vpop.xlane.xlu0 %778 }
 0x2ad   :  { %v785_v19 = vsub.f32 %v771_v17, %v779_v18  ;;  %vm781_vm5 = vcmp.eq.f32.partialorder %v764_v28, %v779_v18  ;;  %v1454_v17 = vand.u32 4294901760, %v1453_v5 }
 0x2ae   :  { %v783_v41 = vsel %vm781_vm5, 0.0, %v764_v28  ;;  %v2930_v28 = vand.u32 4294901760, %v1314_v57 }
 0x2af   :  { %2403 = vrcp.f32 %v785_v19 }
 0x2b0   :  { %v2943_v8 = vsub.f32 %v1314_v57, %v2930_v28 }
 0x2b2   :  { %v2955_v10 = vand.u32 4294901760, %v2943_v8 }
 0x2b4   :  { %v2402_v24 = vpop.eup %2401  ;;  %3303 = vst [vmem:[#allocation8_spill] sm:$0xff] %v2955_v10  ;;  %v1460_v18 = vsub.f32 %v2943_v8, %v2955_v10 }
 0x2b5   :  { %v787_v30 = vmul.f32 %v2402_v24, %v782_v25  ;;  %v1310_v25 = vld [vmem:[%s3269_s2 + $0x30] sm:$0xff] }
 0x2b7   :  { %v808_v32 = vsel %vm765_vm3, %v787_v30, 0  ;;  %v1461_v30 = vand.u32 4294901760, %v1460_v18 }
 0x2b8   :  { %v879_v9 = vand.u32 4294901760, %v808_v32 }
 0x2ba   :  { %2159 = vmatprep.mubr.f32.mxu1 %v879_v9  ;;  %v880_v37 = vsub.f32 %v808_v32, %v879_v9  ;;  %v2984_v32 = vsub.f32 %v1311_v16, %v2972_v23 }
 0x2bc   :  { %v2404_v40 = vpop.eup %2403  ;;  %v881_v42 = vand.u32 4294901760, %v880_v37 }
 0x2bd   :  { %v789_v49 = vmul.f32 %v2404_v40, %v783_v41  ;;  %v2997_v41 = vand.u32 4294901760, %v2984_v32 }
 0x2be   :  { %v882_v55 = vsub.f32 %v880_v37, %v881_v42 }
 0x2bf   :  { %v811_v58 = vsel %vm765_vm3, %v789_v49, 0  ;;  %3306 = vst [vmem:[#allocation11_spill] sm:$0xff] %v2997_v41 }
 0x2c0   :  { %v889_v59 = vand.u32 4294901760, %v811_v58  ;;  %v883_v63 = vand.u32 4294901760, %v882_v55 }
 0x2c2   :  { %v890_v15 = vsub.f32 %v811_v58, %v889_v59  ;;  %2154 = vmatprep.mubr.f32.mxu0 %v883_v63  ;;  %2160 = vmatmul.mubr.f32.vlgmr.msra.gmra.mxu1 %v889_v59  ;;  %v1308_v58 = vld [vmem:[%s3269_s2 + $0x20] sm:$0xff] }
 0x2c3   :  { %2169 = vmatprep.mubr.f32.mxu1 %v881_v42  ;;  %2168 = vmatpush3.msra.mxu1 %v844_v22 }
 0x2c4   :  { %v891_v44 = vand.u32 4294901760, %v890_v15  ;;  %2177 = vmatprep.subr.mxu1 %v844_v22 }
 0x2c6   :  { %v892_v54 = vsub.f32 %v890_v15, %v891_v44  ;;  %2170 = vmatmul.mubr.f32.vlgmr.msra.gmra.mxu1 %v891_v44 }
 0x2c7   :  { %2179 = vmatprep.mubr.f32.mxu1 %v879_v9  ;;  %2178 = vmatpush3.msra.mxu1 %v844_v22  ;;  %v2945_v22 = vand.u32 4294901760, %v1313_v1 }
 0x2c8   :  { %v893_v60 = vand.u32 4294901760, %v892_v54  ;;  %2217 = vmatprep.subr.mxu1 %v1426_v47 }
 0x2c9   :  { %v2958_v11 = vsub.f32 %v1313_v1, %v2945_v22 }
 0x2ca   :  { %2155 = vmatmul.mubr.f32.vlgmr.msra.gmra.mxu0 %v893_v60  ;;  %2180 = vmatmul.mubr.f32.vlgmr.msra.gmra.mxu1 %v889_v59 }
 0x2cb   :  { %2163 = vmatpush3.msra.mxu0 %v2848_v3  ;;  %2164 = vmatprep.mubr.f32.mxu0 %v880_v37  ;;  %v1312_v3 = vld [vmem:[%s3269_s2 + $0x40] sm:$0xff]  ;;  %v2970_v19 = vand.u32 4294901760, %v2958_v11  ;;  %v1309_v37 = vld [vmem:[%s3269_s2 + $0x28] sm:$0xff] }
 0x2cc   :  { %2172 = vmatprep.subr.mxu0 %v2851_v4  ;;  %2218 = vmatpush3.msra.mxu1 %v1426_v47  ;;  %v2961_v12 = vand.u32 4294901760, %v1312_v3  ;;  %v3002_v49 = vand.u32 4294901760, %v1309_v37  ;;  %v1307_v47 = vld [vmem:[%s3269_s2 + $0x18] sm:$0xff] }
 0x2cd   :  { %2219 = vmatprep.subr.mxu1 %v1433_v62  ;;  %3304 = vst [vmem:[#allocation9_spill] sm:$0xff] %v2970_v19  ;;  %v1467_v31 = vsub.f32 %v2958_v11, %v2970_v19 }
 0x2ce   :  { %2165 = vmatmul.mubr.f32.vlgmr.msra.gmra.mxu0 %v890_v15  ;;  %2220 = vmatpush3.msra.mxu1 %v1433_v62  ;;  %v2975_v24 = vsub.f32 %v1312_v3, %v2961_v12  ;;  %v3017_v6 = vsub.f32 %v1309_v37, %v3002_v49  ;;  %v3019_v15 = vand.u32 4294901760, %v1308_v58  ;;  %v3035_v62 = vand.u32 4294901760, %v1307_v47  ;;  %v1305_v3 = vld [vmem:[%s3269_s2 + $0x8] sm:$0xff] }
 0x2cf   :  { %2173 = vmatpush3.msra.mxu0 %v2851_v4  ;;  %2174 = vmatprep.mubr.f32.mxu0 %v879_v9  ;;  %v1447_v4 = vand.u32 4294901760, %v1446_v21  ;;  %v2986_v9 = vand.u32 4294901760, %v1310_v25  ;;  %v1468_v40 = vand.u32 4294901760, %v1467_v31 }
 0x2d0   :  { %2221 = vmatprep.subr.mxu1 %v1440_v0  ;;  %2182 = vmatprep.subr.mxu0 %v2859_v26  ;;  %v2990_v35 = vand.u32 4294901760, %v2975_v24  ;;  %v3029_v60 = vand.u32 4294901760, %v3017_v6  ;;  %v3032_v61 = vsub.f32 %v1308_v58, %v3019_v15  ;;  %v3050_v21 = vsub.f32 %v1307_v47, %v3035_v62 }
 0x2d1   :  { %2222 = vmatpush3.msra.mxu1 %v1440_v0  ;;  %v3000_v42 = vsub.f32 %v1310_v25, %v2986_v9  ;;  %v1306_v0 = vld [vmem:[%s3269_s2 + $0x10] sm:$0xff]  ;;  %v1304_v25 = vld [vmem:[%s3269_s2] sm:$0xff]  ;;  %s2439_s2 = smov [#allocation2]  }
 0x2d2   :  { %2175 = vmatmul.mubr.f32.vlgmr.msra.gmra.mxu0 %v889_v59  ;;  %2223 = vmatprep.subr.mxu1 %v1447_v4  ;;  %3305 = vst [vmem:[#allocation10_spill] sm:$0xff] %v2990_v35  ;;  %v1474_v55 = vsub.f32 %v2975_v24, %v2990_v35  ;;  %v1481_v59 = vsub.f32 %v2984_v32, %v2997_v41  ;;  %3308 = vst [vmem:[#allocation13_spill] sm:$0xff] %v3029_v60  ;;  %v3044_v57 = vand.u32 4294901760, %v3032_v61  ;;  %s2013_s30 = sshll.u32 %s2439_s2, 4  ;;  %s2014_s30 = int_to_ptr.vmem [resolvable:$true] %s2013_s30 }
 0x2d3   :  { %2183 = vmatpush3.msra.mxu0 %v2859_v26  ;;  %2224 = vmatpush3.msra.mxu1 %v1447_v4  ;;  %v3014_v63 = vand.u32 4294901760, %v3000_v42  ;;  %v1495_v51 = vsub.f32 %v3017_v6, %v3029_v60  ;;  %v3046_v1 = vand.u32 4294901760, %v1306_v0  ;;  %v3065_v18 = vand.u32 4294901760, %v3050_v21  ;;  %s2415_s9 = scalar_lea.vmem %s2014_s30, 256  ;;  %p2420_p1 = scmp.lt.s32.totalorder %s2014_s30, %s2014_s30 }
 0x2d4   :  { %2184 = vmatprep.subr.mxu0 %v2868_v34  ;;  %2225 = vmatprep.subr.mxu1 %v1454_v17  ;;  %v1475_v44 = vand.u32 4294901760, %v1474_v55  ;;  %v1482_v53 = vand.u32 4294901760, %v1481_v59  ;;  %3309 = vst [vmem:[#allocation14_spill] sm:$0xff] %v3044_v57  ;;  %v1502_v5 = vsub.f32 %v3032_v61, %v3044_v57  ;;  %p2416_p0 = scmp.ne.s32.totalorder %s2014_s30, %s2415_s9  ;;  %p2421_p2 = scmp.lt.s32.totalorder %s2415_s9, %s2415_s9 }
 0x2d5   :  { %2185 = vmatpush3.msra.mxu0 %v2868_v34  ;;  %2226 = vmatpush3.msra.mxu1 %v1454_v17  ;;  %3307 = vst [vmem:[#allocation12_spill] sm:$0xff] %v3014_v63  ;;  %v1488_v54 = vsub.f32 %v3000_v42, %v3014_v63  ;;  %v1496_v4 = vand.u32 4294901760, %v1495_v51  ;;  %v3059_v16 = vsub.f32 %v1306_v0, %v3046_v1  ;;  %v3061_v17 = vand.u32 4294901760, %v1305_v3 }
 0x2d6   :  { %2186 = vmatprep.subr.mxu0 %v2876_v46  ;;  %2227 = vmatprep.subr.mxu1 %v1461_v30  ;;  %3310 = vst [vmem:[#allocation15_spill] sm:$0xff] %v3065_v18  ;;  %v1509_v55 = vsub.f32 %v3050_v21, %v3065_v18  ;;  %p2422_p3 = por %p2421_p2, %p2420_p1 }
 0x2d7   :  { %2187 = vmatpush3.msra.mxu0 %v2876_v46  ;;  %2228 = vmatpush3.msra.mxu1 %v1461_v30  ;;  %v1489_v39 = vand.u32 4294901760, %v1488_v54  ;;  %v1503_v30 = vand.u32 4294901760, %v1502_v5  ;;  %v3072_v31 = vand.u32 4294901760, %v3059_v16  ;;  %v3075_v37 = vsub.f32 %v1305_v3, %v3061_v17 }
 0x2d8   :  { %2188 = vmatprep.subr.mxu0 %v2909_v29  ;;  %2229 = vmatprep.subr.mxu1 %v1468_v40  ;;  %v1510_v47 = vand.u32 4294901760, %v1509_v55  ;;  %v2024_v5 = vmul.f32 -1.442695, %v2831_v2  ;;  %p2423_p4 = pnand %p2422_p3, %p2416_p0 }
 0x2d9   :  { %2189 = vmatpush3.msra.mxu0 %v2909_v29  ;;  %2230 = vmatpush3.msra.mxu1 %v1468_v40  ;;  %3311 = vst [vmem:[#allocation16_spill] sm:$0xff] %v3072_v31  ;;  %v3077_v40 = vand.u32 4294901760, %v1304_v25  ;;  %v1516_v58 = vsub.f32 %v3059_v16, %v3072_v31  ;;  %v3086_v59 = vand.u32 4294901760, %v3075_v37 }
 0x2da   :  { %2190 = vmatprep.subr.mxu0 %v2917_v52  ;;  %2231 = vmatprep.subr.mxu1 %v1475_v44 }
 0x2db   :  { %2191 = vmatpush3.msra.mxu0 %v2917_v52  ;;  %2232 = vmatpush3.msra.mxu1 %v1475_v44  ;;  %3312 = vst [vmem:[#allocation17_spill] sm:$0xff] %v3086_v59  ;;  %v3089_v44 = vsub.f32 %v1304_v25, %v3077_v40  ;;  %v1523_v54 = vsub.f32 %v3075_v37, %v3086_v59 }
 0x2dc   :  { %2192 = vmatprep.subr.mxu0 %v2930_v28  ;;  %2233 = vmatprep.subr.mxu1 %v1482_v53 }
 0x2dd   :  { %2193 = vmatpush3.msra.mxu0 %v2930_v28  ;;  %2234 = vmatpush3.msra.mxu1 %v1482_v53  ;;  %v1517_v53 = vand.u32 4294901760, %v1516_v58  ;;  %v3096_v0 = vand.u32 4294901760, %v3089_v44 }
 0x2de   :  { %2194 = vmatprep.subr.mxu0 %v2945_v22  ;;  %2235 = vmatprep.subr.mxu1 %v1489_v39 }
 0x2df   :  { %2195 = vmatpush3.msra.mxu0 %v2945_v22  ;;  %2236 = vmatpush3.msra.mxu1 %v1489_v39  ;;  %3313 = vst [vmem:[#allocation18_spill] sm:$0xff] %v3096_v0  ;;  %v1524_v39 = vand.u32 4294901760, %v1523_v54  ;;  %v1530_v51 = vsub.f32 %v3089_v44, %v3096_v0 }
 0x2e0   :  { %2196 = vmatprep.subr.mxu0 %v2961_v12  ;;  %2237 = vmatprep.subr.mxu1 %v1496_v4 }
 0x2e1   :  { %2197 = vmatpush3.msra.mxu0 %v2961_v12  ;;  %2238 = vmatpush3.msra.mxu1 %v1496_v4  ;;  %v1531_v3 = vand.u32 4294901760, %v1530_v51  ;;  %v2025_v4 = vmul.f32 -1.442695, %v2836_v43 }
 0x2e2   :  { %2198 = vmatprep.subr.mxu0 %v2972_v23  ;;  %2239 = vmatprep.subr.mxu1 %v1503_v30 }
 0x2e3   :  { %2199 = vmatpush3.msra.mxu0 %v2972_v23  ;;  %2240 = vmatpush3.msra.mxu1 %v1503_v30  ;;  %2405 = vpow2.f32 %v2025_v4 }
 0x2e4   :  { %2200 = vmatprep.subr.mxu0 %v2986_v9  ;;  %2241 = vmatprep.subr.mxu1 %v1510_v47  ;;  %2407 = vpow2.f32 %v2024_v5 }
 0x2e5   :  { %2201 = vmatpush3.msra.mxu0 %v2986_v9  ;;  %2242 = vmatpush3.msra.mxu1 %v1510_v47  ;;  %v736_v47 = vpop.f32.mrf.mxu1 }
 0x2e6   :  { %2202 = vmatprep.subr.mxu0 %v3002_v49  ;;  %2243 = vmatprep.subr.mxu1 %v1517_v53 }
 0x2e7   :  { %2203 = vmatpush3.msra.mxu0 %v3002_v49  ;;  %2244 = vmatpush3.msra.mxu1 %v1517_v53 }
 0x2e8   :  { %2204 = vmatprep.subr.mxu0 %v3019_v15  ;;  %2245 = vmatprep.subr.mxu1 %v1524_v39 }
 0x2e9   :  { %2205 = vmatpush3.msra.mxu0 %v3019_v15  ;;  %2246 = vmatpush3.msra.mxu1 %v1524_v39  ;;  %v641_v39 = vpop.f32.mrf.mxu0 }
 0x2ea   :  { %2206 = vmatprep.subr.mxu0 %v3035_v62  ;;  %2247 = vmatprep.subr.mxu1 %v1531_v3 }
 0x2eb   :  { %2207 = vmatpush3.msra.mxu0 %v3035_v62  ;;  %2248 = vmatpush3.msra.mxu1 %v1531_v3 }
 0x2ec   :  { %2208 = vmatprep.subr.mxu0 %v3046_v1  ;;  %2287 = vmatprep.subr.mxu1 %v2859_v26 }
 0x2ed   :  { %2209 = vmatpush3.msra.mxu0 %v3046_v1 }
 0x2ee   :  { %2210 = vmatprep.subr.mxu0 %v3061_v17 }
 0x2ef   :  { %2211 = vmatpush3.msra.mxu0 %v3061_v17 }
 0x2f0   :  { %2212 = vmatprep.subr.mxu0 %v3077_v40  ;;  %v2406_v25 = vpop.eup %2405 }
 0x2f1   :  { %2213 = vmatpush3.msra.mxu0 %v3077_v40  ;;  %v2408_v30 = vpop.eup %2407  ;;  %v797_v55 = vadd.f32 1.0, %v2406_v25  ;;  %v642_v25 = vadd.f32 %v641_v39, %v2829_v36 }
 0x2f2   :  { %2252 = vmatprep.subr.mxu0 %v2866_v33  ;;  %v796_v58 = vadd.f32 1.0, %v2408_v30 }
 0x2f3   :  { %2409 = vrcp.f32 %v797_v55  ;;  %v737_v10 = vadd.f32 %v736_v47, %v642_v25  ;;  %v2414_v47 = vld [vmem:[%s3267_s0] sm:$0xff] }
 0x2f4   :  { %2411 = vrcp.f32 %v796_v58 }
 0x300   :  { %v2410_v31 = vpop.eup %2409 }
 0x301   :  { %v2412_v5 = vpop.eup %2411  ;;  %v803_v30 = vmul.f32 %v2410_v31, %v2836_v43 }
 0x302   :  { %v802_v19 = vmul.f32 %v2412_v5, %v2831_v2 }
 0x303   :  { %v805_v27 = vmul.f32 %v803_v30, %v737_v10 }
 0x382   :  { %v2161_v53 = vpop.f32.mrf.mxu1 }
 0x384   :  { %v971_v54 = vpop.f32.mrf.mxu1 }
 0x386   :  { %v2171_v51 = vpop.f32.mrf.mxu1 }
 0x388   :  { %v1132_v18 = vpop.f32.mrf.mxu1 }
 0x38a   :  { %v2156_v3 = vpop.f32.mrf.mxu0  ;;  %v2181_v58 = vpop.f32.mrf.mxu1 }
 0x38b   :  { %v978_v59 = vadd.f32 %v2161_v53, %v2156_v3 }
 0x38c   :  { %v885_v0 = vpop.f32.mrf.mxu0 }
 0x38d   :  { %v972_v60 = vadd.f32 %v971_v54, %v885_v0 }
 0x38e   :  { %v2166_v57 = vpop.f32.mrf.mxu0 }
 0x38f   :  { %v1059_v4 = vadd.f32 %v2166_v57, %v978_v59  ;;  %v1292_v57 = vpop.f32.mrf.mxu1  ;;  %v804_v59 = vmul.f32 %v802_v19, %v2833_v13 }
 0x390   :  { %v1051_v63 = vpop.f32.mrf.mxu0 }
 0x391   :  { %v1052_v55 = vadd.f32 %v1051_v63, %v972_v60  ;;  %v1141_v41 = vadd.f32 %v2171_v51, %v1059_v4 }
 0x392   :  { %v2176_v35 = vpop.f32.mrf.mxu0 }
 0x393   :  { %v1221_v20 = vadd.f32 %v2176_v35, %v1141_v41  ;;  %v1133_v53 = vadd.f32 %v1132_v18, %v1052_v55 }
 0x394   :  { %v1214_v3 = vpop.f32.mrf.mxu0 }
 0x395   :  { %v1299_v48 = vadd.f32 %v2181_v58, %v1221_v20  ;;  %v1215_v0 = vadd.f32 %v1214_v3, %v1133_v53 }
 0x397   :  { %v1303_v54 = vmul.f32 %v1299_v48, %v805_v27  ;;  %v1293_v36 = vadd.f32 %v1292_v57, %v1215_v0 }
 0x399   :  { %v3109_v39 = vand.u32 4294901760, %v1303_v54  ;;  %v1302_v43 = vmul.f32 %v1293_v36, %v804_v59 }
 0x39b   :  { %v3112_v63 = vsub.f32 %v1303_v54, %v3109_v39  ;;  %v3114_v60 = vand.u32 4294901760, %v1302_v43 }
 0x39d   :  { %v1402_v2 = vsub.f32 %v1302_v43, %v3114_v60  ;;  %2249 = vmatprep.mubr.f32.mxu1 %v3114_v60  ;;  %v1413_v20 = vand.u32 4294901760, %v3112_v63 }
 0x39e   :  { %2250 = vmatmul.mubr.f32.vlgmr.msra.gmra.mxu1 %v3109_v39 }
 0x39f   :  { %2288 = vmatpush3.msra.mxu1 %v2859_v26  ;;  %v1403_v13 = vand.u32 4294901760, %v1402_v2  ;;  %v1414_v48 = vsub.f32 %v3112_v63, %v1413_v20 }
 0x3a0   :  { %2289 = vmatprep.subr.mxu1 %v2868_v34 }
 0x3a1   :  { %2290 = vmatpush3.msra.mxu1 %v2868_v34  ;;  %2319 = vmatprep.mubr.f32.mxu1 %v1403_v13  ;;  %v1404_v27 = vsub.f32 %v1402_v2, %v1403_v13  ;;  %v1415_v19 = vand.u32 4294901760, %v1414_v48 }
 0x3a2   :  { %2291 = vmatprep.subr.mxu1 %v2876_v46 }
 0x3a3   :  { %2292 = vmatpush3.msra.mxu1 %v2876_v46  ;;  %v1405_v10 = vand.u32 4294901760, %v1404_v27 }
 0x3a4   :  { %2293 = vmatprep.subr.mxu1 %v2909_v29 }
 0x3a5   :  { %2294 = vmatpush3.msra.mxu1 %v2909_v29  ;;  %2214 = vmatprep.mubr.f32.mxu0 %v1405_v10 }
 0x3a6   :  { %2295 = vmatprep.subr.mxu1 %v2917_v52  ;;  %2215 = vmatmul.mubr.f32.vlgmr.msra.gmra.mxu0 %v1415_v19 }
 0x3a7   :  { %2253 = vmatpush3.msra.mxu0 %v2866_v33  ;;  %2296 = vmatpush3.msra.mxu1 %v2917_v52  ;;  %v3315_v33 = vld [vmem:[#allocation6_spill] sm:$0xff] }
 0x3a8   :  { %2254 = vmatprep.subr.mxu0 %v2879_v50  ;;  %2284 = vmatprep.mubr.f32.mxu0 %v1402_v2 }
 0x3a9   :  { %2297 = vmatprep.subr.mxu1 %v2930_v28  ;;  %2255 = vmatpush3.msra.mxu0 %v2879_v50  ;;  %v3319_v50 = vld [vmem:[#allocation10_spill] sm:$0xff] }
 0x3aa   :  { %2298 = vmatpush3.msra.mxu1 %v2930_v28  ;;  %2256 = vmatprep.subr.mxu0 %v2885_v7 }
 0x3ab   :  { %2299 = vmatprep.subr.mxu1 %v2945_v22  ;;  %2257 = vmatpush3.msra.mxu0 %v2885_v7  ;;  %v3320_v7 = vld [vmem:[#allocation11_spill] sm:$0xff] }
 0x3ac   :  { %2300 = vmatpush3.msra.mxu1 %v2945_v22  ;;  %2258 = vmatprep.subr.mxu0 %v2915_v38 }
 0x3ad   :  { %2301 = vmatprep.subr.mxu1 %v2961_v12  ;;  %2259 = vmatpush3.msra.mxu0 %v2915_v38  ;;  %v3323_v38 = vld [vmem:[#allocation14_spill] sm:$0xff] }
 0x3ae   :  { %2302 = vmatpush3.msra.mxu1 %v2961_v12  ;;  %2260 = vmatprep.subr.mxu0 %v2928_v56 }
 0x3af   :  { %2303 = vmatprep.subr.mxu1 %v2972_v23  ;;  %2261 = vmatpush3.msra.mxu0 %v2928_v56  ;;  %v3325_v56 = vld [vmem:[#allocation16_spill] sm:$0xff] }
 0x3b0   :  { %2304 = vmatpush3.msra.mxu1 %v2972_v23  ;;  %2262 = vmatprep.subr.mxu0 %v2943_v8 }
 0x3b1   :  { %2305 = vmatprep.subr.mxu1 %v2986_v9  ;;  %2263 = vmatpush3.msra.mxu0 %v2943_v8  ;;  %v3327_v8 = vld [vmem:[#allocation18_spill] sm:$0xff] }
 0x3b2   :  { %2306 = vmatpush3.msra.mxu1 %v2986_v9  ;;  %2264 = vmatprep.subr.mxu0 %v2958_v11 }
 0x3b3   :  { %2307 = vmatprep.subr.mxu1 %v3002_v49  ;;  %2265 = vmatpush3.msra.mxu0 %v2958_v11 }
 0x3b4   :  { %2308 = vmatpush3.msra.mxu1 %v3002_v49  ;;  %2266 = vmatprep.subr.mxu0 %v2975_v24 }
 0x3b5   :  { %2309 = vmatprep.subr.mxu1 %v3019_v15  ;;  %2267 = vmatpush3.msra.mxu0 %v2975_v24 }
 0x3b6   :  { %2310 = vmatpush3.msra.mxu1 %v3019_v15  ;;  %2268 = vmatprep.subr.mxu0 %v2984_v32 }
 0x3b7   :  { %2311 = vmatprep.subr.mxu1 %v3035_v62  ;;  %2269 = vmatpush3.msra.mxu0 %v2984_v32 }
 0x3b8   :  { %2312 = vmatpush3.msra.mxu1 %v3035_v62  ;;  %2270 = vmatprep.subr.mxu0 %v3000_v42 }
 0x3b9   :  { %2313 = vmatprep.subr.mxu1 %v3046_v1  ;;  %2271 = vmatpush3.msra.mxu0 %v3000_v42 }
 0x3ba   :  { %2314 = vmatpush3.msra.mxu1 %v3046_v1  ;;  %2272 = vmatprep.subr.mxu0 %v3017_v6 }
 0x3bb   :  { %2315 = vmatprep.subr.mxu1 %v3061_v17  ;;  %2273 = vmatpush3.msra.mxu0 %v3017_v6 }
 0x3bc   :  { %2316 = vmatpush3.msra.mxu1 %v3061_v17  ;;  %2274 = vmatprep.subr.mxu0 %v3032_v61 }
 0x3bd   :  { %2317 = vmatprep.subr.mxu1 %v3077_v40  ;;  %2275 = vmatpush3.msra.mxu0 %v3032_v61 }
 0x3be   :  { %2318 = vmatpush3.msra.mxu1 %v3077_v40  ;;  %2276 = vmatprep.subr.mxu0 %v3050_v21 }
 0x3bf   :  { %2320 = vmatmul.mubr.f32.vlgmr.msra.gmra.mxu1 %v1413_v20  ;;  %2357 = vmatprep.subr.mxu1 %v2859_v26 }
 0x3c0   :  { %2277 = vmatpush3.msra.mxu0 %v3050_v21  ;;  %2358 = vmatpush3.msra.mxu1 %v2859_v26  ;;  %v3314_v26 = vld [vmem:[#allocation5_spill] sm:$0xff] }
 0x3c1   :  { %2389 = vmatprep.mubr.f32.mxu1 %v3114_v60  ;;  %2278 = vmatprep.subr.mxu0 %v3059_v16 }
 0x3c2   :  { %2359 = vmatprep.subr.mxu1 %v2868_v34  ;;  %2279 = vmatpush3.msra.mxu0 %v3059_v16 }
 0x3c3   :  { %2360 = vmatpush3.msra.mxu1 %v2868_v34  ;;  %2280 = vmatprep.subr.mxu0 %v3075_v37  ;;  %v3316_v34 = vld [vmem:[#allocation7_spill] sm:$0xff] }
 0x3c4   :  { %2361 = vmatprep.subr.mxu1 %v2876_v46  ;;  %2281 = vmatpush3.msra.mxu0 %v3075_v37  ;;  %v2413_v37 = vld [vmem:[%s3267_s0 + $0x8] sm:$0xff] }
 0x3c5   :  { %2362 = vmatpush3.msra.mxu1 %v2876_v46  ;;  %2282 = vmatprep.subr.mxu0 %v3089_v44  ;;  %v3318_v46 = vld [vmem:[#allocation9_spill] sm:$0xff] }
 0x3c6   :  { %2363 = vmatprep.subr.mxu1 %v2909_v29  ;;  %2283 = vmatpush3.msra.mxu0 %v3089_v44 }
 0x3c7   :  { %2364 = vmatpush3.msra.mxu1 %v2909_v29  ;;  %2285 = vmatmul.mubr.f32.vlgmr.msra.gmra.mxu0 %v3112_v63  ;;  %v3322_v29 = vld [vmem:[#allocation13_spill] sm:$0xff] }
 0x3c8   :  { %2322 = vmatprep.subr.mxu0 %v2874_v45  ;;  %2365 = vmatprep.subr.mxu1 %v2917_v52 }
 0x3c9   :  { %2323 = vmatpush3.msra.mxu0 %v2874_v45  ;;  %2354 = vmatprep.mubr.f32.mxu0 %v3114_v60  ;;  %v3317_v45 = vld [vmem:[#allocation8_spill] sm:$0xff] }
 0x3ca   :  { %2366 = vmatpush3.msra.mxu1 %v2917_v52  ;;  %2324 = vmatprep.subr.mxu0 %v2888_v14  ;;  %v3324_v52 = vld [vmem:[#allocation15_spill] sm:$0xff] }
 0x3cb   :  { %2367 = vmatprep.subr.mxu1 %v2930_v28  ;;  %2325 = vmatpush3.msra.mxu0 %v2888_v14  ;;  %v3321_v14 = vld [vmem:[#allocation12_spill] sm:$0xff] }
 0x3cc   :  { %2368 = vmatpush3.msra.mxu1 %v2930_v28  ;;  %2326 = vmatprep.subr.mxu0 %v3314_v26  ;;  %v3326_v28 = vld [vmem:[#allocation17_spill] sm:$0xff] }
 0x3cd   :  { %2369 = vmatprep.subr.mxu1 %v2945_v22  ;;  %2327 = vmatpush3.msra.mxu0 %v3314_v26 }
 0x3ce   :  { %2370 = vmatpush3.msra.mxu1 %v2945_v22  ;;  %2328 = vmatprep.subr.mxu0 %v3315_v33 }
 0x3cf   :  { %2371 = vmatprep.subr.mxu1 %v2961_v12  ;;  %2329 = vmatpush3.msra.mxu0 %v3315_v33 }
 0x3d0   :  { %2372 = vmatpush3.msra.mxu1 %v2961_v12  ;;  %2330 = vmatprep.subr.mxu0 %v3316_v34 }
 0x3d1   :  { %2373 = vmatprep.subr.mxu1 %v2972_v23  ;;  %2331 = vmatpush3.msra.mxu0 %v3316_v34 }
 0x3d2   :  { %2374 = vmatpush3.msra.mxu1 %v2972_v23  ;;  %2332 = vmatprep.subr.mxu0 %v3317_v45 }
 0x3d3   :  { %2375 = vmatprep.subr.mxu1 %v2986_v9  ;;  %2333 = vmatpush3.msra.mxu0 %v3317_v45 }
 0x3d4   :  { %2376 = vmatpush3.msra.mxu1 %v2986_v9  ;;  %2334 = vmatprep.subr.mxu0 %v3318_v46 }
 0x3d5   :  { %2377 = vmatprep.subr.mxu1 %v3002_v49  ;;  %2335 = vmatpush3.msra.mxu0 %v3318_v46 }
 0x3d6   :  { %2378 = vmatpush3.msra.mxu1 %v3002_v49  ;;  %2336 = vmatprep.subr.mxu0 %v3319_v50 }
 0x3d7   :  { %2379 = vmatprep.subr.mxu1 %v3019_v15  ;;  %2337 = vmatpush3.msra.mxu0 %v3319_v50 }
 0x3d8   :  { %2380 = vmatpush3.msra.mxu1 %v3019_v15  ;;  %2338 = vmatprep.subr.mxu0 %v3320_v7 }
 0x3d9   :  { %2381 = vmatprep.subr.mxu1 %v3035_v62  ;;  %2339 = vmatpush3.msra.mxu0 %v3320_v7 }
 0x3da   :  { %2382 = vmatpush3.msra.mxu1 %v3035_v62  ;;  %2340 = vmatprep.subr.mxu0 %v3321_v14 }
 0x3db   :  { %2383 = vmatprep.subr.mxu1 %v3046_v1  ;;  %2341 = vmatpush3.msra.mxu0 %v3321_v14 }
 0x3dc   :  { %2384 = vmatpush3.msra.mxu1 %v3046_v1  ;;  %2342 = vmatprep.subr.mxu0 %v3322_v29 }
 0x3dd   :  { %2385 = vmatprep.subr.mxu1 %v3061_v17  ;;  %2343 = vmatpush3.msra.mxu0 %v3322_v29 }
 0x3de   :  { %2386 = vmatpush3.msra.mxu1 %v3061_v17  ;;  %2344 = vmatprep.subr.mxu0 %v3323_v38 }
 0x3df   :  { %2387 = vmatprep.subr.mxu1 %v3077_v40  ;;  %2345 = vmatpush3.msra.mxu0 %v3323_v38 }
 0x3e0   :  { %2388 = vmatpush3.msra.mxu1 %v3077_v40  ;;  %2346 = vmatprep.subr.mxu0 %v3324_v52 }
 0x3e1   :  { %2390 = vmatmul.mubr.f32.vlgmr.msra.gmra.mxu1 %v3109_v39  ;;  %2347 = vmatpush3.msra.mxu0 %v3324_v52 }
 0x3e2   :  { %2348 = vmatprep.subr.mxu0 %v3325_v56 }
 0x3e3   :  { %2349 = vmatpush3.msra.mxu0 %v3325_v56 }
 0x3e4   :  { %2350 = vmatprep.subr.mxu0 %v3326_v28 }
 0x3e5   :  { %2351 = vmatpush3.msra.mxu0 %v3326_v28 }
 0x3e6   :  { %2352 = vmatprep.subr.mxu0 %v3327_v8 }
 0x3e7   :  { %2353 = vmatpush3.msra.mxu0 %v3327_v8 }
 0x3e8   :  { %2355 = vmatmul.mubr.f32.vlgmr.msra.gmra.mxu0 %v3109_v39 }
 0x45e   :  { %v2251_v11 = vpop.f32.mrf.mxu1 }
 0x460   :  { %v1568_v24 = vpop.f32.mrf.mxu1 }
 0x466   :  { %v2216_v22 = vpop.f32.mrf.mxu0 }
 0x467   :  { %v1575_v32 = vadd.f32 %v2251_v11, %v2216_v22 }
 0x468   :  { %v1407_v12 = vpop.f32.mrf.mxu0 }
 0x469   :  { %v1569_v41 = vadd.f32 %v1568_v24, %v1407_v12 }
 0x47f   :  { %v2321_v9 = vpop.f32.mrf.mxu1 }
 0x481   :  { %v1774_v6 = vpop.f32.mrf.mxu1 }
 0x487   :  { %v2286_v23 = vpop.f32.mrf.mxu0 }
 0x488   :  { %v1686_v42 = vadd.f32 %v2286_v23, %v1575_v32 }
 0x489   :  { %v1678_v35 = vpop.f32.mrf.mxu0 }
 0x48a   :  { %v1679_v49 = vadd.f32 %v1678_v35, %v1569_v41  ;;  %v1783_v15 = vadd.f32 %v2321_v9, %v1686_v42 }
 0x48c   :  { %v1775_v21 = vadd.f32 %v1774_v6, %v1679_v49 }
 0x4a1   :  { %v2391_v61 = vpop.f32.mrf.mxu1 }
 0x4a3   :  { %v1994_v31 = vpop.f32.mrf.mxu1 }
 0x4a8   :  { %v2356_v62 = vpop.f32.mrf.mxu0 }
 0x4a9   :  { %v1908_v1 = vadd.f32 %v2356_v62, %v1783_v15 }
 0x4aa   :  { %v1901_v16 = vpop.f32.mrf.mxu0 }
 0x4ab   :  { %v2001_v17 = vadd.f32 %v2391_v61, %v1908_v1  ;;  %v1902_v18 = vadd.f32 %v1901_v16, %v1775_v21 }
 0x4ad   :  { %v2005_v40 = vadd.f32 %v2413_v37, %v2001_v17  ;;  %v1995_v44 = vadd.f32 %v1994_v31, %v1902_v18 }
 0x4af   :  { %2007 = vst.msk [vmem:[#allocation2 + $0x8] sm:$0xff] %vm36_vm0, %v2005_v40  ;;  %v2004_v51 = vadd.f32 %v2414_v47, %v1995_v44 }
 0x4b1   :  { %2006 = vst.msk [vmem:[#allocation2] sm:$0xff] %vm36_vm0, %v2004_v51 }
 0x4b2   :  { %2426 = shalt.err (!%p2423_p4)
}
 0x4b3   :  { %s2440_s10 = smov 128   ;;  %s2441_s11 = smov 8  }
 0x4b4   :  { %2019 = dma.vmem_to_hbm [thread:$0]  %s2014_s30, 256, %s3271_s4, [#allocation3], %s2440_s10, %s2440_s10, %s2441_s11  }
 0x4b5   :  { %2435 = dma.done.wait [#allocation3], 256  }
 0x4b6   :  { %2436 = vsyncadd [#allocation3], 4294967040 }
 0x4b7   :  { %2023 = vsyncpa [#allocation3], 1 }

</bundles_post_ra>
